<compile_context>
chip_gen: v5e
topology: v5e:2x2
jax: 0.10.0
libtpu: 0.0.40
codegen_flags: <defaults>
</compile_context>

<pallas_src>
import functools

import jax
import jax.numpy as jnp
from jax.experimental import pallas as pl
from jax.experimental.pallas import tpu as pltpu


def _round_up(x: int, m: int) -> int:
    return ((x + m - 1) // m) * m


def _embedding_gather_kernel(ids_ref, emb_hbm, out_ref, dma_sems,
                             *, block_tokens: int, max_inflight: int):
    """Gather `block_tokens` embedding rows into the (T, D) output VMEM block.

    ids_ref   : SMEM (N_pad,) int32 — scalar-prefetched, already clamped to [0, V-1].
    emb_hbm   : raw HBM ref (V, D) — memory_space=pl.ANY, no auto-DMA.
    out_ref   : VMEM (T, D) output block for this grid step.
    dma_sems  : (K,) DMA semaphores — rolling window of in-flight row copies.
    """
    base = pl.program_id(0) * block_tokens

    copies = [None] * block_tokens
    for t in range(block_tokens):            # static unroll: descriptor issue only
        slot = t % max_inflight
        if t >= max_inflight:
            # Free this semaphore slot before reusing it (keeps K DMAs in flight).
            copies[t - max_inflight].wait()
        row = ids_ref[base + t]               # dynamic scalar read from SMEM
        cp = pltpu.make_async_copy(
            emb_hbm.at[pl.ds(row, 1), :],     # (1, D) row of the table in HBM
            out_ref.at[pl.ds(t, 1), :],       # (1, D) row of the output block in VMEM
            dma_sems.at[slot],
        )
        cp.start()
        copies[t] = cp

    # Drain the remaining in-flight copies before the block is written back.
    for t in range(max(block_tokens - max_inflight, 0), block_tokens):
        copies[t].wait()


def embedding_lookup(token_ids: jax.Array, emb: jax.Array,
                     *, block_tokens: int = 64, max_inflight: int = 16) -> jax.Array:
    """token_ids: (B, S) int, emb: (V, D) -> (B, S, D) with out dtype == emb dtype."""
    B, S = token_ids.shape
    V, D = emb.shape
    N = B * S

    # Clamp ids so padding / out-of-range ids can never trigger an OOB HBM DMA.
    flat_ids = jnp.clip(token_ids.reshape(N).astype(jnp.int32), 0, V - 1)

    # Tokens per grid step: multiple of 8 (sublane-dense output tiles), capped for
    # tiny inputs so we don't over-pad the demo shapes.
    T = min(block_tokens, _round_up(N, 8))
    T = max(8, (T // 8) * 8)
    K = min(max_inflight, T)

    N_pad = _round_up(N, T)
    if N_pad != N:
        # Padded slots gather row 0 (valid) and are sliced off below.
        flat_ids = jnp.pad(flat_ids, (0, N_pad - N))

    kernel = functools.partial(
        _embedding_gather_kernel, block_tokens=T, max_inflight=K
    )

    grid_spec = pltpu.PrefetchScalarGridSpec(
        num_scalar_prefetch=1,
        grid=(N_pad // T,),
        in_specs=[
            # Full embedding table stays in HBM; rows are gathered manually in-kernel.
            pl.BlockSpec(memory_space=pl.ANY),
        ],
        out_specs=pl.BlockSpec((T, D), lambda i, ids: (i, 0)),
        scratch_shapes=[pltpu.SemaphoreType.DMA((K,))],
    )

    out_flat = pl.pallas_call(
        kernel,
        out_shape=jax.ShapeDtypeStruct((N_pad, D), emb.dtype),
        grid_spec=grid_spec,
        compiler_params=pltpu.CompilerParams(
            # Every block is independent -> let v7x shard across both TensorCores.
            dimension_semantics=("parallel",),
        ),
    )(flat_ids, emb)

    return out_flat[:N].reshape(B, S, D)


def init_embedding(key, num_embeddings: int, embedding_dim: int) -> jax.Array:
    # Matches torch.nn.init.trunc_normal_(mean=0, std=2/(V+D), a=-2, b=2):
    # a/b are absolute cutoffs, so convert to standard-normal units before sampling.
    std = 2.0 / (num_embeddings + embedding_dim)
    lower = -2.0 / std
    upper = 2.0 / std
    w = jax.random.truncated_normal(
        key, lower, upper, (num_embeddings, embedding_dim), dtype=jnp.float32
    )
    return w * std


if __name__ == "__main__":
    num_embeddings = 64
    embedding_dim = 128
    batch, seq = 2, 8

    key = jax.random.PRNGKey(0)
    k_emb, k_ids = jax.random.split(key)

    emb = init_embedding(k_emb, num_embeddings, embedding_dim)
    token_ids = jax.random.randint(
        k_ids, (batch, seq), minval=0, maxval=num_embeddings, dtype=jnp.int32
    )

    out = embedding_lookup(token_ids, emb)
    out = jax.block_until_ready(out)

    # Reference check (plain JAX gather).
    ref = emb[token_ids]
    assert out.shape == (batch, seq, embedding_dim), out.shape
    assert out.dtype == emb.dtype, out.dtype
    assert jnp.allclose(out, ref), "mismatch vs reference gather"

    print("KERNEL_OK")
</pallas_src>

<mosaic_0001>
module attributes {stable_mosaic.version = 11 : i64} {
  func.func @_embedding_gather_kernel(%arg0: i32, %arg1: memref<16xi32, #tpu.memory_space<smem>>, %arg2: memref<64x128xf32, #tpu.memory_space<any>>, %arg3: memref<16x128xf32, #tpu.memory_space<vmem>>, %arg4: memref<16x!tpu.dma_semaphore, #tpu.memory_space<semaphore_mem>>) attributes {dimension_semantics = [#tpu.dimension_semantics<parallel>], iteration_bounds = array<i64: 1>, scalar_prefetch = 1 : i64, scratch_operands = 1 : i64, tpu.core_type = #tpu.core_type<tc>, window_params = [{}, {transform_indices = @transform_1, window_bounds = array<i64: 16, 128>}]} {
    %c16_i32 = arith.constant 16 : i32
    %0 = arith.muli %arg0, %c16_i32 : i32
    %c0_i32 = arith.constant 0 : i32
    %1 = arith.addi %0, %c0_i32 : i32
    %2 = arith.index_cast %1 : i32 to index
    %3 = memref.load %arg1[%2] : memref<16xi32, #tpu.memory_space<smem>>
    %c0_i32_0 = arith.constant 0 : i32
    %c0_i32_1 = arith.constant 0 : i32
    %4 = tpu.memref_slice %arg2[%3, %c0_i32_1] : memref<64x128xf32, #tpu.memory_space<any>> -> memref<1x128xf32, #tpu.memory_space<any>>
    %c0_i32_2 = arith.constant 0 : i32
    %c0_i32_3 = arith.constant 0 : i32
    %5 = tpu.memref_slice %arg3[%c0_i32_2, %c0_i32_3] : memref<16x128xf32, #tpu.memory_space<vmem>> -> memref<1x128xf32, #tpu.memory_space<vmem>>
    %6 = tpu.memref_slice %arg4[%c0_i32_0] : memref<16x!tpu.dma_semaphore, #tpu.memory_space<semaphore_mem>> -> memref<1x!tpu.dma_semaphore, #tpu.memory_space<semaphore_mem>>
    %7 = tpu.memref_squeeze %6 : memref<1x!tpu.dma_semaphore, #tpu.memory_space<semaphore_mem>> -> memref<!tpu.dma_semaphore, #tpu.memory_space<semaphore_mem>>
    tpu.enqueue_dma source(%4 : memref<1x128xf32, #tpu.memory_space<any>>) target(%5 : memref<1x128xf32, #tpu.memory_space<vmem>>) target_semaphore(%7 : memref<!tpu.dma_semaphore, #tpu.memory_space<semaphore_mem>>)
    %c1_i32 = arith.constant 1 : i32
    %8 = arith.addi %0, %c1_i32 : i32
    %9 = arith.index_cast %8 : i32 to index
    %10 = memref.load %arg1[%9] : memref<16xi32, #tpu.memory_space<smem>>
    %c1_i32_4 = arith.constant 1 : i32
    %c0_i32_5 = arith.constant 0 : i32
    %11 = tpu.memref_slice %arg2[%10, %c0_i32_5] : memref<64x128xf32, #tpu.memory_space<any>> -> memref<1x128xf32, #tpu.memory_space<any>>
    %c1_i32_6 = arith.constant 1 : i32
    %c0_i32_7 = arith.constant 0 : i32
    %12 = tpu.memref_slice %arg3[%c1_i32_6, %c0_i32_7] : memref<16x128xf32, #tpu.memory_space<vmem>> -> memref<1x128xf32, #tpu.memory_space<vmem>>
    %13 = tpu.memref_slice %arg4[%c1_i32_4] : memref<16x!tpu.dma_semaphore, #tpu.memory_space<semaphore_mem>> -> memref<1x!tpu.dma_semaphore, #tpu.memory_space<semaphore_mem>>
    %14 = tpu.memref_squeeze %13 : memref<1x!tpu.dma_semaphore, #tpu.memory_space<semaphore_mem>> -> memref<!tpu.dma_semaphore, #tpu.memory_space<semaphore_mem>>
    tpu.enqueue_dma source(%11 : memref<1x128xf32, #tpu.memory_space<any>>) target(%12 : memref<1x128xf32, #tpu.memory_space<vmem>>) target_semaphore(%14 : memref<!tpu.dma_semaphore, #tpu.memory_space<semaphore_mem>>)
    %c2_i32 = arith.constant 2 : i32
    %15 = arith.addi %0, %c2_i32 : i32
    %16 = arith.index_cast %15 : i32 to index
    %17 = memref.load %arg1[%16] : memref<16xi32, #tpu.memory_space<smem>>
    %c2_i32_8 = arith.constant 2 : i32
    %c0_i32_9 = arith.constant 0 : i32
    %18 = tpu.memref_slice %arg2[%17, %c0_i32_9] : memref<64x128xf32, #tpu.memory_space<any>> -> memref<1x128xf32, #tpu.memory_space<any>>
    %c2_i32_10 = arith.constant 2 : i32
    %c0_i32_11 = arith.constant 0 : i32
    %19 = tpu.memref_slice %arg3[%c2_i32_10, %c0_i32_11] : memref<16x128xf32, #tpu.memory_space<vmem>> -> memref<1x128xf32, #tpu.memory_space<vmem>>
    %20 = tpu.memref_slice %arg4[%c2_i32_8] : memref<16x!tpu.dma_semaphore, #tpu.memory_space<semaphore_mem>> -> memref<1x!tpu.dma_semaphore, #tpu.memory_space<semaphore_mem>>
    %21 = tpu.memref_squeeze %20 : memref<1x!tpu.dma_semaphore, #tpu.memory_space<semaphore_mem>> -> memref<!tpu.dma_semaphore, #tpu.memory_space<semaphore_mem>>
    tpu.enqueue_dma source(%18 : memref<1x128xf32, #tpu.memory_space<any>>) target(%19 : memref<1x128xf32, #tpu.memory_space<vmem>>) target_semaphore(%21 : memref<!tpu.dma_semaphore, #tpu.memory_space<semaphore_mem>>)
    %c3_i32 = arith.constant 3 : i32
    %22 = arith.addi %0, %c3_i32 : i32
    %23 = arith.index_cast %22 : i32 to index
    %24 = memref.load %arg1[%23] : memref<16xi32, #tpu.memory_space<smem>>
    %c3_i32_12 = arith.constant 3 : i32
    %c0_i32_13 = arith.constant 0 : i32
    %25 = tpu.memref_slice %arg2[%24, %c0_i32_13] : memref<64x128xf32, #tpu.memory_space<any>> -> memref<1x128xf32, #tpu.memory_space<any>>
    %c3_i32_14 = arith.constant 3 : i32
    %c0_i32_15 = arith.constant 0 : i32
    %26 = tpu.memref_slice %arg3[%c3_i32_14, %c0_i32_15] : memref<16x128xf32, #tpu.memory_space<vmem>> -> memref<1x128xf32, #tpu.memory_space<vmem>>
    %27 = tpu.memref_slice %arg4[%c3_i32_12] : memref<16x!tpu.dma_semaphore, #tpu.memory_space<semaphore_mem>> -> memref<1x!tpu.dma_semaphore, #tpu.memory_space<semaphore_mem>>
    %28 = tpu.memref_squeeze %27 : memref<1x!tpu.dma_semaphore, #tpu.memory_space<semaphore_mem>> -> memref<!tpu.dma_semaphore, #tpu.memory_space<semaphore_mem>>
    tpu.enqueue_dma source(%25 : memref<1x128xf32, #tpu.memory_space<any>>) target(%26 : memref<1x128xf32, #tpu.memory_space<vmem>>) target_semaphore(%28 : memref<!tpu.dma_semaphore, #tpu.memory_space<semaphore_mem>>)
    %c4_i32 = arith.constant 4 : i32
    %29 = arith.addi %0, %c4_i32 : i32
    %30 = arith.index_cast %29 : i32 to index
    %31 = memref.load %arg1[%30] : memref<16xi32, #tpu.memory_space<smem>>
    %c4_i32_16 = arith.constant 4 : i32
    %c0_i32_17 = arith.constant 0 : i32
    %32 = tpu.memref_slice %arg2[%31, %c0_i32_17] : memref<64x128xf32, #tpu.memory_space<any>> -> memref<1x128xf32, #tpu.memory_space<any>>
    %c4_i32_18 = arith.constant 4 : i32
    %c0_i32_19 = arith.constant 0 : i32
    %33 = tpu.memref_slice %arg3[%c4_i32_18, %c0_i32_19] : memref<16x128xf32, #tpu.memory_space<vmem>> -> memref<1x128xf32, #tpu.memory_space<vmem>>
    %34 = tpu.memref_slice %arg4[%c4_i32_16] : memref<16x!tpu.dma_semaphore, #tpu.memory_space<semaphore_mem>> -> memref<1x!tpu.dma_semaphore, #tpu.memory_space<semaphore_mem>>
    %35 = tpu.memref_squeeze %34 : memref<1x!tpu.dma_semaphore, #tpu.memory_space<semaphore_mem>> -> memref<!tpu.dma_semaphore, #tpu.memory_space<semaphore_mem>>
    tpu.enqueue_dma source(%32 : memref<1x128xf32, #tpu.memory_space<any>>) target(%33 : memref<1x128xf32, #tpu.memory_space<vmem>>) target_semaphore(%35 : memref<!tpu.dma_semaphore, #tpu.memory_space<semaphore_mem>>)
    %c5_i32 = arith.constant 5 : i32
    %36 = arith.addi %0, %c5_i32 : i32
    %37 = arith.index_cast %36 : i32 to index
    %38 = memref.load %arg1[%37] : memref<16xi32, #tpu.memory_space<smem>>
    %c5_i32_20 = arith.constant 5 : i32
    %c0_i32_21 = arith.constant 0 : i32
    %39 = tpu.memref_slice %arg2[%38, %c0_i32_21] : memref<64x128xf32, #tpu.memory_space<any>> -> memref<1x128xf32, #tpu.memory_space<any>>
    %c5_i32_22 = arith.constant 5 : i32
    %c0_i32_23 = arith.constant 0 : i32
    %40 = tpu.memref_slice %arg3[%c5_i32_22, %c0_i32_23] : memref<16x128xf32, #tpu.memory_space<vmem>> -> memref<1x128xf32, #tpu.memory_space<vmem>>
    %41 = tpu.memref_slice %arg4[%c5_i32_20] : memref<16x!tpu.dma_semaphore, #tpu.memory_space<semaphore_mem>> -> memref<1x!tpu.dma_semaphore, #tpu.memory_space<semaphore_mem>>
    %42 = tpu.memref_squeeze %41 : memref<1x!tpu.dma_semaphore, #tpu.memory_space<semaphore_mem>> -> memref<!tpu.dma_semaphore, #tpu.memory_space<semaphore_mem>>
    tpu.enqueue_dma source(%39 : memref<1x128xf32, #tpu.memory_space<any>>) target(%40 : memref<1x128xf32, #tpu.memory_space<vmem>>) target_semaphore(%42 : memref<!tpu.dma_semaphore, #tpu.memory_space<semaphore_mem>>)
    %c6_i32 = arith.constant 6 : i32
    %43 = arith.addi %0, %c6_i32 : i32
    %44 = arith.index_cast %43 : i32 to index
    %45 = memref.load %arg1[%44] : memref<16xi32, #tpu.memory_space<smem>>
    %c6_i32_24 = arith.constant 6 : i32
    %c0_i32_25 = arith.constant 0 : i32
    %46 = tpu.memref_slice %arg2[%45, %c0_i32_25] : memref<64x128xf32, #tpu.memory_space<any>> -> memref<1x128xf32, #tpu.memory_space<any>>
    %c6_i32_26 = arith.constant 6 : i32
    %c0_i32_27 = arith.constant 0 : i32
    %47 = tpu.memref_slice %arg3[%c6_i32_26, %c0_i32_27] : memref<16x128xf32, #tpu.memory_space<vmem>> -> memref<1x128xf32, #tpu.memory_space<vmem>>
    %48 = tpu.memref_slice %arg4[%c6_i32_24] : memref<16x!tpu.dma_semaphore, #tpu.memory_space<semaphore_mem>> -> memref<1x!tpu.dma_semaphore, #tpu.memory_space<semaphore_mem>>
    %49 = tpu.memref_squeeze %48 : memref<1x!tpu.dma_semaphore, #tpu.memory_space<semaphore_mem>> -> memref<!tpu.dma_semaphore, #tpu.memory_space<semaphore_mem>>
    tpu.enqueue_dma source(%46 : memref<1x128xf32, #tpu.memory_space<any>>) target(%47 : memref<1x128xf32, #tpu.memory_space<vmem>>) target_semaphore(%49 : memref<!tpu.dma_semaphore, #tpu.memory_space<semaphore_mem>>)
    %c7_i32 = arith.constant 7 : i32
    %50 = arith.addi %0, %c7_i32 : i32
    %51 = arith.index_cast %50 : i32 to index
    %52 = memref.load %arg1[%51] : memref<16xi32, #tpu.memory_space<smem>>
    %c7_i32_28 = arith.constant 7 : i32
    %c0_i32_29 = arith.constant 0 : i32
    %53 = tpu.memref_slice %arg2[%52, %c0_i32_29] : memref<64x128xf32, #tpu.memory_space<any>> -> memref<1x128xf32, #tpu.memory_space<any>>
    %c7_i32_30 = arith.constant 7 : i32
    %c0_i32_31 = arith.constant 0 : i32
    %54 = tpu.memref_slice %arg3[%c7_i32_30, %c0_i32_31] : memref<16x128xf32, #tpu.memory_space<vmem>> -> memref<1x128xf32, #tpu.memory_space<vmem>>
    %55 = tpu.memref_slice %arg4[%c7_i32_28] : memref<16x!tpu.dma_semaphore, #tpu.memory_space<semaphore_mem>> -> memref<1x!tpu.dma_semaphore, #tpu.memory_space<semaphore_mem>>
    %56 = tpu.memref_squeeze %55 : memref<1x!tpu.dma_semaphore, #tpu.memory_space<semaphore_mem>> -> memref<!tpu.dma_semaphore, #tpu.memory_space<semaphore_mem>>
    tpu.enqueue_dma source(%53 : memref<1x128xf32, #tpu.memory_space<any>>) target(%54 : memref<1x128xf32, #tpu.memory_space<vmem>>) target_semaphore(%56 : memref<!tpu.dma_semaphore, #tpu.memory_space<semaphore_mem>>)
    %c8_i32 = arith.constant 8 : i32
    %57 = arith.addi %0, %c8_i32 : i32
    %58 = arith.index_cast %57 : i32 to index
    %59 = memref.load %arg1[%58] : memref<16xi32, #tpu.memory_space<smem>>
    %c8_i32_32 = arith.constant 8 : i32
    %c0_i32_33 = arith.constant 0 : i32
    %60 = tpu.memref_slice %arg2[%59, %c0_i32_33] : memref<64x128xf32, #tpu.memory_space<any>> -> memref<1x128xf32, #tpu.memory_space<any>>
    %c8_i32_34 = arith.constant 8 : i32
    %c0_i32_35 = arith.constant 0 : i32
    %61 = tpu.memref_slice %arg3[%c8_i32_34, %c0_i32_35] : memref<16x128xf32, #tpu.memory_space<vmem>> -> memref<1x128xf32, #tpu.memory_space<vmem>>
    %62 = tpu.memref_slice %arg4[%c8_i32_32] : memref<16x!tpu.dma_semaphore, #tpu.memory_space<semaphore_mem>> -> memref<1x!tpu.dma_semaphore, #tpu.memory_space<semaphore_mem>>
    %63 = tpu.memref_squeeze %62 : memref<1x!tpu.dma_semaphore, #tpu.memory_space<semaphore_mem>> -> memref<!tpu.dma_semaphore, #tpu.memory_space<semaphore_mem>>
    tpu.enqueue_dma source(%60 : memref<1x128xf32, #tpu.memory_space<any>>) target(%61 : memref<1x128xf32, #tpu.memory_space<vmem>>) target_semaphore(%63 : memref<!tpu.dma_semaphore, #tpu.memory_space<semaphore_mem>>)
    %c9_i32 = arith.constant 9 : i32
    %64 = arith.addi %0, %c9_i32 : i32
    %65 = arith.index_cast %64 : i32 to index
    %66 = memref.load %arg1[%65] : memref<16xi32, #tpu.memory_space<smem>>
    %c9_i32_36 = arith.constant 9 : i32
    %c0_i32_37 = arith.constant 0 : i32
    %67 = tpu.memref_slice %arg2[%66, %c0_i32_37] : memref<64x128xf32, #tpu.memory_space<any>> -> memref<1x128xf32, #tpu.memory_space<any>>
    %c9_i32_38 = arith.constant 9 : i32
    %c0_i32_39 = arith.constant 0 : i32
    %68 = tpu.memref_slice %arg3[%c9_i32_38, %c0_i32_39] : memref<16x128xf32, #tpu.memory_space<vmem>> -> memref<1x128xf32, #tpu.memory_space<vmem>>
    %69 = tpu.memref_slice %arg4[%c9_i32_36] : memref<16x!tpu.dma_semaphore, #tpu.memory_space<semaphore_mem>> -> memref<1x!tpu.dma_semaphore, #tpu.memory_space<semaphore_mem>>
    %70 = tpu.memref_squeeze %69 : memref<1x!tpu.dma_semaphore, #tpu.memory_space<semaphore_mem>> -> memref<!tpu.dma_semaphore, #tpu.memory_space<semaphore_mem>>
    tpu.enqueue_dma source(%67 : memref<1x128xf32, #tpu.memory_space<any>>) target(%68 : memref<1x128xf32, #tpu.memory_space<vmem>>) target_semaphore(%70 : memref<!tpu.dma_semaphore, #tpu.memory_space<semaphore_mem>>)
    %c10_i32 = arith.constant 10 : i32
    %71 = arith.addi %0, %c10_i32 : i32
    %72 = arith.index_cast %71 : i32 to index
    %73 = memref.load %arg1[%72] : memref<16xi32, #tpu.memory_space<smem>>
    %c10_i32_40 = arith.constant 10 : i32
    %c0_i32_41 = arith.constant 0 : i32
    %74 = tpu.memref_slice %arg2[%73, %c0_i32_41] : memref<64x128xf32, #tpu.memory_space<any>> -> memref<1x128xf32, #tpu.memory_space<any>>
    %c10_i32_42 = arith.constant 10 : i32
    %c0_i32_43 = arith.constant 0 : i32
    %75 = tpu.memref_slice %arg3[%c10_i32_42, %c0_i32_43] : memref<16x128xf32, #tpu.memory_space<vmem>> -> memref<1x128xf32, #tpu.memory_space<vmem>>
    %76 = tpu.memref_slice %arg4[%c10_i32_40] : memref<16x!tpu.dma_semaphore, #tpu.memory_space<semaphore_mem>> -> memref<1x!tpu.dma_semaphore, #tpu.memory_space<semaphore_mem>>
    %77 = tpu.memref_squeeze %76 : memref<1x!tpu.dma_semaphore, #tpu.memory_space<semaphore_mem>> -> memref<!tpu.dma_semaphore, #tpu.memory_space<semaphore_mem>>
    tpu.enqueue_dma source(%74 : memref<1x128xf32, #tpu.memory_space<any>>) target(%75 : memref<1x128xf32, #tpu.memory_space<vmem>>) target_semaphore(%77 : memref<!tpu.dma_semaphore, #tpu.memory_space<semaphore_mem>>)
    %c11_i32 = arith.constant 11 : i32
    %78 = arith.addi %0, %c11_i32 : i32
    %79 = arith.index_cast %78 : i32 to index
    %80 = memref.load %arg1[%79] : memref<16xi32, #tpu.memory_space<smem>>
    %c11_i32_44 = arith.constant 11 : i32
    %c0_i32_45 = arith.constant 0 : i32
    %81 = tpu.memref_slice %arg2[%80, %c0_i32_45] : memref<64x128xf32, #tpu.memory_space<any>> -> memref<1x128xf32, #tpu.memory_space<any>>
    %c11_i32_46 = arith.constant 11 : i32
    %c0_i32_47 = arith.constant 0 : i32
    %82 = tpu.memref_slice %arg3[%c11_i32_46, %c0_i32_47] : memref<16x128xf32, #tpu.memory_space<vmem>> -> memref<1x128xf32, #tpu.memory_space<vmem>>
    %83 = tpu.memref_slice %arg4[%c11_i32_44] : memref<16x!tpu.dma_semaphore, #tpu.memory_space<semaphore_mem>> -> memref<1x!tpu.dma_semaphore, #tpu.memory_space<semaphore_mem>>
    %84 = tpu.memref_squeeze %83 : memref<1x!tpu.dma_semaphore, #tpu.memory_space<semaphore_mem>> -> memref<!tpu.dma_semaphore, #tpu.memory_space<semaphore_mem>>
    tpu.enqueue_dma source(%81 : memref<1x128xf32, #tpu.memory_space<any>>) target(%82 : memref<1x128xf32, #tpu.memory_space<vmem>>) target_semaphore(%84 : memref<!tpu.dma_semaphore, #tpu.memory_space<semaphore_mem>>)
    %c12_i32 = arith.constant 12 : i32
    %85 = arith.addi %0, %c12_i32 : i32
    %86 = arith.index_cast %85 : i32 to index
    %87 = memref.load %arg1[%86] : memref<16xi32, #tpu.memory_space<smem>>
    %c12_i32_48 = arith.constant 12 : i32
    %c0_i32_49 = arith.constant 0 : i32
    %88 = tpu.memref_slice %arg2[%87, %c0_i32_49] : memref<64x128xf32, #tpu.memory_space<any>> -> memref<1x128xf32, #tpu.memory_space<any>>
    %c12_i32_50 = arith.constant 12 : i32
    %c0_i32_51 = arith.constant 0 : i32
    %89 = tpu.memref_slice %arg3[%c12_i32_50, %c0_i32_51] : memref<16x128xf32, #tpu.memory_space<vmem>> -> memref<1x128xf32, #tpu.memory_space<vmem>>
    %90 = tpu.memref_slice %arg4[%c12_i32_48] : memref<16x!tpu.dma_semaphore, #tpu.memory_space<semaphore_mem>> -> memref<1x!tpu.dma_semaphore, #tpu.memory_space<semaphore_mem>>
    %91 = tpu.memref_squeeze %90 : memref<1x!tpu.dma_semaphore, #tpu.memory_space<semaphore_mem>> -> memref<!tpu.dma_semaphore, #tpu.memory_space<semaphore_mem>>
    tpu.enqueue_dma source(%88 : memref<1x128xf32, #tpu.memory_space<any>>) target(%89 : memref<1x128xf32, #tpu.memory_space<vmem>>) target_semaphore(%91 : memref<!tpu.dma_semaphore, #tpu.memory_space<semaphore_mem>>)
    %c13_i32 = arith.constant 13 : i32
    %92 = arith.addi %0, %c13_i32 : i32
    %93 = arith.index_cast %92 : i32 to index
    %94 = memref.load %arg1[%93] : memref<16xi32, #tpu.memory_space<smem>>
    %c13_i32_52 = arith.constant 13 : i32
    %c0_i32_53 = arith.constant 0 : i32
    %95 = tpu.memref_slice %arg2[%94, %c0_i32_53] : memref<64x128xf32, #tpu.memory_space<any>> -> memref<1x128xf32, #tpu.memory_space<any>>
    %c13_i32_54 = arith.constant 13 : i32
    %c0_i32_55 = arith.constant 0 : i32
    %96 = tpu.memref_slice %arg3[%c13_i32_54, %c0_i32_55] : memref<16x128xf32, #tpu.memory_space<vmem>> -> memref<1x128xf32, #tpu.memory_space<vmem>>
    %97 = tpu.memref_slice %arg4[%c13_i32_52] : memref<16x!tpu.dma_semaphore, #tpu.memory_space<semaphore_mem>> -> memref<1x!tpu.dma_semaphore, #tpu.memory_space<semaphore_mem>>
    %98 = tpu.memref_squeeze %97 : memref<1x!tpu.dma_semaphore, #tpu.memory_space<semaphore_mem>> -> memref<!tpu.dma_semaphore, #tpu.memory_space<semaphore_mem>>
    tpu.enqueue_dma source(%95 : memref<1x128xf32, #tpu.memory_space<any>>) target(%96 : memref<1x128xf32, #tpu.memory_space<vmem>>) target_semaphore(%98 : memref<!tpu.dma_semaphore, #tpu.memory_space<semaphore_mem>>)
    %c14_i32 = arith.constant 14 : i32
    %99 = arith.addi %0, %c14_i32 : i32
    %100 = arith.index_cast %99 : i32 to index
    %101 = memref.load %arg1[%100] : memref<16xi32, #tpu.memory_space<smem>>
    %c14_i32_56 = arith.constant 14 : i32
    %c0_i32_57 = arith.constant 0 : i32
    %102 = tpu.memref_slice %arg2[%101, %c0_i32_57] : memref<64x128xf32, #tpu.memory_space<any>> -> memref<1x128xf32, #tpu.memory_space<any>>
    %c14_i32_58 = arith.constant 14 : i32
    %c0_i32_59 = arith.constant 0 : i32
    %103 = tpu.memref_slice %arg3[%c14_i32_58, %c0_i32_59] : memref<16x128xf32, #tpu.memory_space<vmem>> -> memref<1x128xf32, #tpu.memory_space<vmem>>
    %104 = tpu.memref_slice %arg4[%c14_i32_56] : memref<16x!tpu.dma_semaphore, #tpu.memory_space<semaphore_mem>> -> memref<1x!tpu.dma_semaphore, #tpu.memory_space<semaphore_mem>>
    %105 = tpu.memref_squeeze %104 : memref<1x!tpu.dma_semaphore, #tpu.memory_space<semaphore_mem>> -> memref<!tpu.dma_semaphore, #tpu.memory_space<semaphore_mem>>
    tpu.enqueue_dma source(%102 : memref<1x128xf32, #tpu.memory_space<any>>) target(%103 : memref<1x128xf32, #tpu.memory_space<vmem>>) target_semaphore(%105 : memref<!tpu.dma_semaphore, #tpu.memory_space<semaphore_mem>>)
    %c15_i32 = arith.constant 15 : i32
    %106 = arith.addi %0, %c15_i32 : i32
    %107 = arith.index_cast %106 : i32 to index
    %108 = memref.load %arg1[%107] : memref<16xi32, #tpu.memory_space<smem>>
    %c15_i32_60 = arith.constant 15 : i32
    %c0_i32_61 = arith.constant 0 : i32
    %109 = tpu.memref_slice %arg2[%108, %c0_i32_61] : memref<64x128xf32, #tpu.memory_space<any>> -> memref<1x128xf32, #tpu.memory_space<any>>
    %c15_i32_62 = arith.constant 15 : i32
    %c0_i32_63 = arith.constant 0 : i32
    %110 = tpu.memref_slice %arg3[%c15_i32_62, %c0_i32_63] : memref<16x128xf32, #tpu.memory_space<vmem>> -> memref<1x128xf32, #tpu.memory_space<vmem>>
    %111 = tpu.memref_slice %arg4[%c15_i32_60] : memref<16x!tpu.dma_semaphore, #tpu.memory_space<semaphore_mem>> -> memref<1x!tpu.dma_semaphore, #tpu.memory_space<semaphore_mem>>
    %112 = tpu.memref_squeeze %111 : memref<1x!tpu.dma_semaphore, #tpu.memory_space<semaphore_mem>> -> memref<!tpu.dma_semaphore, #tpu.memory_space<semaphore_mem>>
    tpu.enqueue_dma source(%109 : memref<1x128xf32, #tpu.memory_space<any>>) target(%110 : memref<1x128xf32, #tpu.memory_space<vmem>>) target_semaphore(%112 : memref<!tpu.dma_semaphore, #tpu.memory_space<semaphore_mem>>)
    %c0_i32_64 = arith.constant 0 : i32
    %c0_i32_65 = arith.constant 0 : i32
    %113 = tpu.memref_slice %arg2[%3, %c0_i32_65] : memref<64x128xf32, #tpu.memory_space<any>> -> memref<1x128xf32, #tpu.memory_space<any>>
    %c0_i32_66 = arith.constant 0 : i32
    %c0_i32_67 = arith.constant 0 : i32
    %114 = tpu.memref_slice %arg3[%c0_i32_66, %c0_i32_67] : memref<16x128xf32, #tpu.memory_space<vmem>> -> memref<1x128xf32, #tpu.memory_space<vmem>>
    %115 = tpu.memref_slice %arg4[%c0_i32_64] : memref<16x!tpu.dma_semaphore, #tpu.memory_space<semaphore_mem>> -> memref<1x!tpu.dma_semaphore, #tpu.memory_space<semaphore_mem>>
    %116 = tpu.memref_squeeze %115 : memref<1x!tpu.dma_semaphore, #tpu.memory_space<semaphore_mem>> -> memref<!tpu.dma_semaphore, #tpu.memory_space<semaphore_mem>>
    tpu.wait_dma2 semaphore(%116 : memref<!tpu.dma_semaphore, #tpu.memory_space<semaphore_mem>>) src(%113 : memref<1x128xf32, #tpu.memory_space<any>>) dst(%114 : memref<1x128xf32, #tpu.memory_space<vmem>>)
    %c1_i32_68 = arith.constant 1 : i32
    %c0_i32_69 = arith.constant 0 : i32
    %117 = tpu.memref_slice %arg2[%10, %c0_i32_69] : memref<64x128xf32, #tpu.memory_space<any>> -> memref<1x128xf32, #tpu.memory_space<any>>
    %c1_i32_70 = arith.constant 1 : i32
    %c0_i32_71 = arith.constant 0 : i32
    %118 = tpu.memref_slice %arg3[%c1_i32_70, %c0_i32_71] : memref<16x128xf32, #tpu.memory_space<vmem>> -> memref<1x128xf32, #tpu.memory_space<vmem>>
    %119 = tpu.memref_slice %arg4[%c1_i32_68] : memref<16x!tpu.dma_semaphore, #tpu.memory_space<semaphore_mem>> -> memref<1x!tpu.dma_semaphore, #tpu.memory_space<semaphore_mem>>
    %120 = tpu.memref_squeeze %119 : memref<1x!tpu.dma_semaphore, #tpu.memory_space<semaphore_mem>> -> memref<!tpu.dma_semaphore, #tpu.memory_space<semaphore_mem>>
    tpu.wait_dma2 semaphore(%120 : memref<!tpu.dma_semaphore, #tpu.memory_space<semaphore_mem>>) src(%117 : memref<1x128xf32, #tpu.memory_space<any>>) dst(%118 : memref<1x128xf32, #tpu.memory_space<vmem>>)
    %c2_i32_72 = arith.constant 2 : i32
    %c0_i32_73 = arith.constant 0 : i32
    %121 = tpu.memref_slice %arg2[%17, %c0_i32_73] : memref<64x128xf32, #tpu.memory_space<any>> -> memref<1x128xf32, #tpu.memory_space<any>>
    %c2_i32_74 = arith.constant 2 : i32
    %c0_i32_75 = arith.constant 0 : i32
    %122 = tpu.memref_slice %arg3[%c2_i32_74, %c0_i32_75] : memref<16x128xf32, #tpu.memory_space<vmem>> -> memref<1x128xf32, #tpu.memory_space<vmem>>
    %123 = tpu.memref_slice %arg4[%c2_i32_72] : memref<16x!tpu.dma_semaphore, #tpu.memory_space<semaphore_mem>> -> memref<1x!tpu.dma_semaphore, #tpu.memory_space<semaphore_mem>>
    %124 = tpu.memref_squeeze %123 : memref<1x!tpu.dma_semaphore, #tpu.memory_space<semaphore_mem>> -> memref<!tpu.dma_semaphore, #tpu.memory_space<semaphore_mem>>
    tpu.wait_dma2 semaphore(%124 : memref<!tpu.dma_semaphore, #tpu.memory_space<semaphore_mem>>) src(%121 : memref<1x128xf32, #tpu.memory_space<any>>) dst(%122 : memref<1x128xf32, #tpu.memory_space<vmem>>)
    %c3_i32_76 = arith.constant 3 : i32
    %c0_i32_77 = arith.constant 0 : i32
    %125 = tpu.memref_slice %arg2[%24, %c0_i32_77] : memref<64x128xf32, #tpu.memory_space<any>> -> memref<1x128xf32, #tpu.memory_space<any>>
    %c3_i32_78 = arith.constant 3 : i32
    %c0_i32_79 = arith.constant 0 : i32
    %126 = tpu.memref_slice %arg3[%c3_i32_78, %c0_i32_79] : memref<16x128xf32, #tpu.memory_space<vmem>> -> memref<1x128xf32, #tpu.memory_space<vmem>>
    %127 = tpu.memref_slice %arg4[%c3_i32_76] : memref<16x!tpu.dma_semaphore, #tpu.memory_space<semaphore_mem>> -> memref<1x!tpu.dma_semaphore, #tpu.memory_space<semaphore_mem>>
    %128 = tpu.memref_squeeze %127 : memref<1x!tpu.dma_semaphore, #tpu.memory_space<semaphore_mem>> -> memref<!tpu.dma_semaphore, #tpu.memory_space<semaphore_mem>>
    tpu.wait_dma2 semaphore(%128 : memref<!tpu.dma_semaphore, #tpu.memory_space<semaphore_mem>>) src(%125 : memref<1x128xf32, #tpu.memory_space<any>>) dst(%126 : memref<1x128xf32, #tpu.memory_space<vmem>>)
    %c4_i32_80 = arith.constant 4 : i32
    %c0_i32_81 = arith.constant 0 : i32
    %129 = tpu.memref_slice %arg2[%31, %c0_i32_81] : memref<64x128xf32, #tpu.memory_space<any>> -> memref<1x128xf32, #tpu.memory_space<any>>
    %c4_i32_82 = arith.constant 4 : i32
    %c0_i32_83 = arith.constant 0 : i32
    %130 = tpu.memref_slice %arg3[%c4_i32_82, %c0_i32_83] : memref<16x128xf32, #tpu.memory_space<vmem>> -> memref<1x128xf32, #tpu.memory_space<vmem>>
    %131 = tpu.memref_slice %arg4[%c4_i32_80] : memref<16x!tpu.dma_semaphore, #tpu.memory_space<semaphore_mem>> -> memref<1x!tpu.dma_semaphore, #tpu.memory_space<semaphore_mem>>
    %132 = tpu.memref_squeeze %131 : memref<1x!tpu.dma_semaphore, #tpu.memory_space<semaphore_mem>> -> memref<!tpu.dma_semaphore, #tpu.memory_space<semaphore_mem>>
    tpu.wait_dma2 semaphore(%132 : memref<!tpu.dma_semaphore, #tpu.memory_space<semaphore_mem>>) src(%129 : memref<1x128xf32, #tpu.memory_space<any>>) dst(%130 : memref<1x128xf32, #tpu.memory_space<vmem>>)
    %c5_i32_84 = arith.constant 5 : i32
    %c0_i32_85 = arith.constant 0 : i32
    %133 = tpu.memref_slice %arg2[%38, %c0_i32_85] : memref<64x128xf32, #tpu.memory_space<any>> -> memref<1x128xf32, #tpu.memory_space<any>>
    %c5_i32_86 = arith.constant 5 : i32
    %c0_i32_87 = arith.constant 0 : i32
    %134 = tpu.memref_slice %arg3[%c5_i32_86, %c0_i32_87] : memref<16x128xf32, #tpu.memory_space<vmem>> -> memref<1x128xf32, #tpu.memory_space<vmem>>
    %135 = tpu.memref_slice %arg4[%c5_i32_84] : memref<16x!tpu.dma_semaphore, #tpu.memory_space<semaphore_mem>> -> memref<1x!tpu.dma_semaphore, #tpu.memory_space<semaphore_mem>>
    %136 = tpu.memref_squeeze %135 : memref<1x!tpu.dma_semaphore, #tpu.memory_space<semaphore_mem>> -> memref<!tpu.dma_semaphore, #tpu.memory_space<semaphore_mem>>
    tpu.wait_dma2 semaphore(%136 : memref<!tpu.dma_semaphore, #tpu.memory_space<semaphore_mem>>) src(%133 : memref<1x128xf32, #tpu.memory_space<any>>) dst(%134 : memref<1x128xf32, #tpu.memory_space<vmem>>)
    %c6_i32_88 = arith.constant 6 : i32
    %c0_i32_89 = arith.constant 0 : i32
    %137 = tpu.memref_slice %arg2[%45, %c0_i32_89] : memref<64x128xf32, #tpu.memory_space<any>> -> memref<1x128xf32, #tpu.memory_space<any>>
    %c6_i32_90 = arith.constant 6 : i32
    %c0_i32_91 = arith.constant 0 : i32
    %138 = tpu.memref_slice %arg3[%c6_i32_90, %c0_i32_91] : memref<16x128xf32, #tpu.memory_space<vmem>> -> memref<1x128xf32, #tpu.memory_space<vmem>>
    %139 = tpu.memref_slice %arg4[%c6_i32_88] : memref<16x!tpu.dma_semaphore, #tpu.memory_space<semaphore_mem>> -> memref<1x!tpu.dma_semaphore, #tpu.memory_space<semaphore_mem>>
    %140 = tpu.memref_squeeze %139 : memref<1x!tpu.dma_semaphore, #tpu.memory_space<semaphore_mem>> -> memref<!tpu.dma_semaphore, #tpu.memory_space<semaphore_mem>>
    tpu.wait_dma2 semaphore(%140 : memref<!tpu.dma_semaphore, #tpu.memory_space<semaphore_mem>>) src(%137 : memref<1x128xf32, #tpu.memory_space<any>>) dst(%138 : memref<1x128xf32, #tpu.memory_space<vmem>>)
    %c7_i32_92 = arith.constant 7 : i32
    %c0_i32_93 = arith.constant 0 : i32
    %141 = tpu.memref_slice %arg2[%52, %c0_i32_93] : memref<64x128xf32, #tpu.memory_space<any>> -> memref<1x128xf32, #tpu.memory_space<any>>
    %c7_i32_94 = arith.constant 7 : i32
    %c0_i32_95 = arith.constant 0 : i32
    %142 = tpu.memref_slice %arg3[%c7_i32_94, %c0_i32_95] : memref<16x128xf32, #tpu.memory_space<vmem>> -> memref<1x128xf32, #tpu.memory_space<vmem>>
    %143 = tpu.memref_slice %arg4[%c7_i32_92] : memref<16x!tpu.dma_semaphore, #tpu.memory_space<semaphore_mem>> -> memref<1x!tpu.dma_semaphore, #tpu.memory_space<semaphore_mem>>
    %144 = tpu.memref_squeeze %143 : memref<1x!tpu.dma_semaphore, #tpu.memory_space<semaphore_mem>> -> memref<!tpu.dma_semaphore, #tpu.memory_space<semaphore_mem>>
    tpu.wait_dma2 semaphore(%144 : memref<!tpu.dma_semaphore, #tpu.memory_space<semaphore_mem>>) src(%141 : memref<1x128xf32, #tpu.memory_space<any>>) dst(%142 : memref<1x128xf32, #tpu.memory_space<vmem>>)
    %c8_i32_96 = arith.constant 8 : i32
    %c0_i32_97 = arith.constant 0 : i32
    %145 = tpu.memref_slice %arg2[%59, %c0_i32_97] : memref<64x128xf32, #tpu.memory_space<any>> -> memref<1x128xf32, #tpu.memory_space<any>>
    %c8_i32_98 = arith.constant 8 : i32
    %c0_i32_99 = arith.constant 0 : i32
    %146 = tpu.memref_slice %arg3[%c8_i32_98, %c0_i32_99] : memref<16x128xf32, #tpu.memory_space<vmem>> -> memref<1x128xf32, #tpu.memory_space<vmem>>
    %147 = tpu.memref_slice %arg4[%c8_i32_96] : memref<16x!tpu.dma_semaphore, #tpu.memory_space<semaphore_mem>> -> memref<1x!tpu.dma_semaphore, #tpu.memory_space<semaphore_mem>>
    %148 = tpu.memref_squeeze %147 : memref<1x!tpu.dma_semaphore, #tpu.memory_space<semaphore_mem>> -> memref<!tpu.dma_semaphore, #tpu.memory_space<semaphore_mem>>
    tpu.wait_dma2 semaphore(%148 : memref<!tpu.dma_semaphore, #tpu.memory_space<semaphore_mem>>) src(%145 : memref<1x128xf32, #tpu.memory_space<any>>) dst(%146 : memref<1x128xf32, #tpu.memory_space<vmem>>)
    %c9_i32_100 = arith.constant 9 : i32
    %c0_i32_101 = arith.constant 0 : i32
    %149 = tpu.memref_slice %arg2[%66, %c0_i32_101] : memref<64x128xf32, #tpu.memory_space<any>> -> memref<1x128xf32, #tpu.memory_space<any>>
    %c9_i32_102 = arith.constant 9 : i32
    %c0_i32_103 = arith.constant 0 : i32
    %150 = tpu.memref_slice %arg3[%c9_i32_102, %c0_i32_103] : memref<16x128xf32, #tpu.memory_space<vmem>> -> memref<1x128xf32, #tpu.memory_space<vmem>>
    %151 = tpu.memref_slice %arg4[%c9_i32_100] : memref<16x!tpu.dma_semaphore, #tpu.memory_space<semaphore_mem>> -> memref<1x!tpu.dma_semaphore, #tpu.memory_space<semaphore_mem>>
    %152 = tpu.memref_squeeze %151 : memref<1x!tpu.dma_semaphore, #tpu.memory_space<semaphore_mem>> -> memref<!tpu.dma_semaphore, #tpu.memory_space<semaphore_mem>>
    tpu.wait_dma2 semaphore(%152 : memref<!tpu.dma_semaphore, #tpu.memory_space<semaphore_mem>>) src(%149 : memref<1x128xf32, #tpu.memory_space<any>>) dst(%150 : memref<1x128xf32, #tpu.memory_space<vmem>>)
    %c10_i32_104 = arith.constant 10 : i32
    %c0_i32_105 = arith.constant 0 : i32
    %153 = tpu.memref_slice %arg2[%73, %c0_i32_105] : memref<64x128xf32, #tpu.memory_space<any>> -> memref<1x128xf32, #tpu.memory_space<any>>
    %c10_i32_106 = arith.constant 10 : i32
    %c0_i32_107 = arith.constant 0 : i32
    %154 = tpu.memref_slice %arg3[%c10_i32_106, %c0_i32_107] : memref<16x128xf32, #tpu.memory_space<vmem>> -> memref<1x128xf32, #tpu.memory_space<vmem>>
    %155 = tpu.memref_slice %arg4[%c10_i32_104] : memref<16x!tpu.dma_semaphore, #tpu.memory_space<semaphore_mem>> -> memref<1x!tpu.dma_semaphore, #tpu.memory_space<semaphore_mem>>
    %156 = tpu.memref_squeeze %155 : memref<1x!tpu.dma_semaphore, #tpu.memory_space<semaphore_mem>> -> memref<!tpu.dma_semaphore, #tpu.memory_space<semaphore_mem>>
    tpu.wait_dma2 semaphore(%156 : memref<!tpu.dma_semaphore, #tpu.memory_space<semaphore_mem>>) src(%153 : memref<1x128xf32, #tpu.memory_space<any>>) dst(%154 : memref<1x128xf32, #tpu.memory_space<vmem>>)
    %c11_i32_108 = arith.constant 11 : i32
    %c0_i32_109 = arith.constant 0 : i32
    %157 = tpu.memref_slice %arg2[%80, %c0_i32_109] : memref<64x128xf32, #tpu.memory_space<any>> -> memref<1x128xf32, #tpu.memory_space<any>>
    %c11_i32_110 = arith.constant 11 : i32
    %c0_i32_111 = arith.constant 0 : i32
    %158 = tpu.memref_slice %arg3[%c11_i32_110, %c0_i32_111] : memref<16x128xf32, #tpu.memory_space<vmem>> -> memref<1x128xf32, #tpu.memory_space<vmem>>
    %159 = tpu.memref_slice %arg4[%c11_i32_108] : memref<16x!tpu.dma_semaphore, #tpu.memory_space<semaphore_mem>> -> memref<1x!tpu.dma_semaphore, #tpu.memory_space<semaphore_mem>>
    %160 = tpu.memref_squeeze %159 : memref<1x!tpu.dma_semaphore, #tpu.memory_space<semaphore_mem>> -> memref<!tpu.dma_semaphore, #tpu.memory_space<semaphore_mem>>
    tpu.wait_dma2 semaphore(%160 : memref<!tpu.dma_semaphore, #tpu.memory_space<semaphore_mem>>) src(%157 : memref<1x128xf32, #tpu.memory_space<any>>) dst(%158 : memref<1x128xf32, #tpu.memory_space<vmem>>)
    %c12_i32_112 = arith.constant 12 : i32
    %c0_i32_113 = arith.constant 0 : i32
    %161 = tpu.memref_slice %arg2[%87, %c0_i32_113] : memref<64x128xf32, #tpu.memory_space<any>> -> memref<1x128xf32, #tpu.memory_space<any>>
    %c12_i32_114 = arith.constant 12 : i32
    %c0_i32_115 = arith.constant 0 : i32
    %162 = tpu.memref_slice %arg3[%c12_i32_114, %c0_i32_115] : memref<16x128xf32, #tpu.memory_space<vmem>> -> memref<1x128xf32, #tpu.memory_space<vmem>>
    %163 = tpu.memref_slice %arg4[%c12_i32_112] : memref<16x!tpu.dma_semaphore, #tpu.memory_space<semaphore_mem>> -> memref<1x!tpu.dma_semaphore, #tpu.memory_space<semaphore_mem>>
    %164 = tpu.memref_squeeze %163 : memref<1x!tpu.dma_semaphore, #tpu.memory_space<semaphore_mem>> -> memref<!tpu.dma_semaphore, #tpu.memory_space<semaphore_mem>>
    tpu.wait_dma2 semaphore(%164 : memref<!tpu.dma_semaphore, #tpu.memory_space<semaphore_mem>>) src(%161 : memref<1x128xf32, #tpu.memory_space<any>>) dst(%162 : memref<1x128xf32, #tpu.memory_space<vmem>>)
    %c13_i32_116 = arith.constant 13 : i32
    %c0_i32_117 = arith.constant 0 : i32
    %165 = tpu.memref_slice %arg2[%94, %c0_i32_117] : memref<64x128xf32, #tpu.memory_space<any>> -> memref<1x128xf32, #tpu.memory_space<any>>
    %c13_i32_118 = arith.constant 13 : i32
    %c0_i32_119 = arith.constant 0 : i32
    %166 = tpu.memref_slice %arg3[%c13_i32_118, %c0_i32_119] : memref<16x128xf32, #tpu.memory_space<vmem>> -> memref<1x128xf32, #tpu.memory_space<vmem>>
    %167 = tpu.memref_slice %arg4[%c13_i32_116] : memref<16x!tpu.dma_semaphore, #tpu.memory_space<semaphore_mem>> -> memref<1x!tpu.dma_semaphore, #tpu.memory_space<semaphore_mem>>
    %168 = tpu.memref_squeeze %167 : memref<1x!tpu.dma_semaphore, #tpu.memory_space<semaphore_mem>> -> memref<!tpu.dma_semaphore, #tpu.memory_space<semaphore_mem>>
    tpu.wait_dma2 semaphore(%168 : memref<!tpu.dma_semaphore, #tpu.memory_space<semaphore_mem>>) src(%165 : memref<1x128xf32, #tpu.memory_space<any>>) dst(%166 : memref<1x128xf32, #tpu.memory_space<vmem>>)
    %c14_i32_120 = arith.constant 14 : i32
    %c0_i32_121 = arith.constant 0 : i32
    %169 = tpu.memref_slice %arg2[%101, %c0_i32_121] : memref<64x128xf32, #tpu.memory_space<any>> -> memref<1x128xf32, #tpu.memory_space<any>>
    %c14_i32_122 = arith.constant 14 : i32
    %c0_i32_123 = arith.constant 0 : i32
    %170 = tpu.memref_slice %arg3[%c14_i32_122, %c0_i32_123] : memref<16x128xf32, #tpu.memory_space<vmem>> -> memref<1x128xf32, #tpu.memory_space<vmem>>
    %171 = tpu.memref_slice %arg4[%c14_i32_120] : memref<16x!tpu.dma_semaphore, #tpu.memory_space<semaphore_mem>> -> memref<1x!tpu.dma_semaphore, #tpu.memory_space<semaphore_mem>>
    %172 = tpu.memref_squeeze %171 : memref<1x!tpu.dma_semaphore, #tpu.memory_space<semaphore_mem>> -> memref<!tpu.dma_semaphore, #tpu.memory_space<semaphore_mem>>
    tpu.wait_dma2 semaphore(%172 : memref<!tpu.dma_semaphore, #tpu.memory_space<semaphore_mem>>) src(%169 : memref<1x128xf32, #tpu.memory_space<any>>) dst(%170 : memref<1x128xf32, #tpu.memory_space<vmem>>)
    %c15_i32_124 = arith.constant 15 : i32
    %c0_i32_125 = arith.constant 0 : i32
    %173 = tpu.memref_slice %arg2[%108, %c0_i32_125] : memref<64x128xf32, #tpu.memory_space<any>> -> memref<1x128xf32, #tpu.memory_space<any>>
    %c15_i32_126 = arith.constant 15 : i32
    %c0_i32_127 = arith.constant 0 : i32
    %174 = tpu.memref_slice %arg3[%c15_i32_126, %c0_i32_127] : memref<16x128xf32, #tpu.memory_space<vmem>> -> memref<1x128xf32, #tpu.memory_space<vmem>>
    %175 = tpu.memref_slice %arg4[%c15_i32_124] : memref<16x!tpu.dma_semaphore, #tpu.memory_space<semaphore_mem>> -> memref<1x!tpu.dma_semaphore, #tpu.memory_space<semaphore_mem>>
    %176 = tpu.memref_squeeze %175 : memref<1x!tpu.dma_semaphore, #tpu.memory_space<semaphore_mem>> -> memref<!tpu.dma_semaphore, #tpu.memory_space<semaphore_mem>>
    tpu.wait_dma2 semaphore(%176 : memref<!tpu.dma_semaphore, #tpu.memory_space<semaphore_mem>>) src(%173 : memref<1x128xf32, #tpu.memory_space<any>>) dst(%174 : memref<1x128xf32, #tpu.memory_space<vmem>>)
    return
  }
  func.func @transform_1(%arg0: i32, %arg1: memref<16xi32, #tpu.memory_space<smem>>) -> (i32, i32) {
    %c0_i32 = arith.constant 0 : i32
    %c0_i32_0 = arith.constant 0 : i32
    return %arg0, %c0_i32 : i32, i32
  }
}

</mosaic_0001>

<bundles_post_ra>
// kernel: tpu_custom_call.1
= control target key start
LH: loop header
LB: loop body
LE: loop exit
PB: predicated region body
PF: predicated region fallthrough
CT: control target
= control target key end

     0   :  { %s986_s12 = smov [#allocation4]   ;;  %s1204_s0 = inlined_call_operand.hbm [shape: s32[16], index: 0, kind: input, shape index: {}]   ;;  %s1205_s1 = inlined_call_operand.hbm [shape: f32[64,128], index: 1, kind: input, shape index: {}]   ;;  %s1206_s2 = inlined_call_operand.hbm [shape: f32[16,128], index: 2, kind: output, shape index: {}]  }
   0x1   :  { %s8_s11 = sshll.u32 %s1204_s0, 4  ;;  %s9_s11 = int_to_ptr.hbm [resolvable:$true] %s8_s11 }
   0x2   :  { %11 = dma.hbm_to_smem %s9_s11, 16, %s986_s12, [#allocation3] }
   0x3   :  { %950 = dma.done.wait [#allocation3], 16 }
   0x4   :  { %951 = vsyncadd [#allocation3], 4294967280 }
   0x5   :  { %14 = sfence }
   0x6   :  { %15 = vsyncpa [#allocation6], 0  ;;  %s17_s13 = sld [smem:[#allocation4]]  ;;  %s987_s14 = smov [#allocation5]  }
   0x7   :  { %s1023_s15 = sshll.u32 %s987_s14, 4  ;;  %s480_s16 = sld [smem:[#allocation4 + $0x1]]  ;;  %s29_s15 = int_to_ptr.vmem [resolvable:$true] %s1023_s15 }
   0x8   :  { %s988_s17 = smov [#allocation5 + $0x1]   ;;  %s1028_s19 = sld [smem:[#allocation4 + $0x2]] }
   0x9   :  { %s1026_s18 = sshll.u32 %s988_s17, 4  ;;  %s989_s0 = smov [#allocation5 + $0x2]   ;;  %s47_s18 = int_to_ptr.vmem [resolvable:$true] %s1026_s18 }
   0xa   :  { %s1031_s20 = sshll.u32 %s989_s0, 4  ;;  %s1033_s21 = sld [smem:[#allocation4 + $0x3]]  ;;  %s65_s20 = int_to_ptr.vmem [resolvable:$true] %s1031_s20 }
   0xb   :  { %s1045_s6 = scalar_lea.hbm %s1205_s1, 64 }
   0xc   :  { %s18_s24 = scalar_lea.hbm %s1205_s1, %s17_s13 }
   0xd   :  { %s26_s25 = sshll.u32 %s18_s24, 4  ;;  %s34_s28 = scalar_lea.hbm %s1205_s1, %s480_s16  ;;  %s27_s25 = int_to_ptr.hbm [resolvable:$true] %s26_s25 }
   0xe   :  { %s44_s29 = sshll.u32 %s34_s28, 4  ;;  %s542_s30 = sshra.s32 %s27_s25, 4  ;;  %s543_s30 = int_to_ptr.hbm [resolvable:$true] %s542_s30  ;;  %s45_s29 = int_to_ptr.hbm [resolvable:$true] %s44_s29 }
   0xf   :  { %s544_s3 = scalar_lea.hbm %s543_s30, 1  ;;  %p547_p1 = scmp.lt.s32.totalorder %s543_s30, %s1205_s1 }
  0x10   :  { %p545_p0 = scmp.ne.s32.totalorder %s543_s30, %s544_s3  ;;  %p548_p2 = scmp.lt.s32.totalorder %s1045_s6, %s544_s3 }
  0x12   :  { %p549_p3 = por %p548_p2, %p547_p1 }
  0x14   :  { %p550_p4 = pnand %p549_p3, %p545_p0 }
  0x16   :  { %553 = shalt.err (!%p550_p4)  }
  0x17   :  { %31 = dma.hbm_to_vmem [thread:$0]  %s27_s25, 16, %s29_s15, [#allocation2] }
  0x18   :  { %s52_s11 = scalar_lea.hbm %s1205_s1, %s1028_s19  ;;  %s566_s12 = sshra.s32 %s45_s29, 4  ;;  %s567_s12 = int_to_ptr.hbm [resolvable:$true] %s566_s12 }
  0x19   :  { %s568_s13 = scalar_lea.hbm %s567_s12, 1  ;;  %p571_p6 = scmp.lt.s32.totalorder %s567_s12, %s1205_s1 }
  0x1a   :  { %p569_p5 = scmp.ne.s32.totalorder %s567_s12, %s568_s13  ;;  %p572_p7 = scmp.lt.s32.totalorder %s1045_s6, %s568_s13 }
  0x1c   :  { %p573_p8 = por %p572_p7, %p571_p6 }
  0x1e   :  { %p574_p9 = pnand %p573_p8, %p569_p5 }
  0x20   :  { %577 = shalt.err (!%p574_p9)  }
  0x21   :  { %49 = dma.hbm_to_vmem [thread:$0]  %s45_s29, 16, %s47_s18, [#allocation2 + $0x1] }
  0x22   :  { %s62_s17 = sshll.u32 %s52_s11, 4  ;;  %s70_s22 = scalar_lea.hbm %s1205_s1, %s1033_s21  ;;  %s63_s17 = int_to_ptr.hbm [resolvable:$true] %s62_s17 }
  0x23   :  { %s80_s23 = sshll.u32 %s70_s22, 4  ;;  %s590_s24 = sshra.s32 %s63_s17, 4  ;;  %s591_s24 = int_to_ptr.hbm [resolvable:$true] %s590_s24  ;;  %s81_s23 = int_to_ptr.hbm [resolvable:$true] %s80_s23 }
  0x24   :  { %s592_s25 = scalar_lea.hbm %s591_s24, 1  ;;  %p595_p11 = scmp.lt.s32.totalorder %s591_s24, %s1205_s1 }
  0x25   :  { %p593_p10 = scmp.ne.s32.totalorder %s591_s24, %s592_s25  ;;  %p596_p12 = scmp.lt.s32.totalorder %s1045_s6, %s592_s25 }
  0x27   :  { %p597_p13 = por %p596_p12, %p595_p11 }
  0x29   :  { %p598_p0 = pnand %p597_p13, %p593_p10 }
  0x2b   :  { %601 = shalt.err (!%p598_p0)  }
  0x2c   :  { %67 = dma.hbm_to_vmem [thread:$0]  %s63_s17, 16, %s65_s20, [#allocation2 + $0x2] }
  0x2d   :  { %s990_s18 = smov [#allocation5 + $0x3]   ;;  %s483_s28 = sld [smem:[#allocation4 + $0x4]] }
  0x2e   :  { %s82_s21 = sshll.u32 %s990_s18, 4  ;;  %s614_s29 = sshra.s32 %s81_s23, 4  ;;  %s83_s21 = int_to_ptr.vmem [resolvable:$true] %s82_s21  ;;  %s615_s29 = int_to_ptr.hbm [resolvable:$true] %s614_s29 }
  0x2f   :  { %s616_s30 = scalar_lea.hbm %s615_s29, 1  ;;  %p619_p2 = scmp.lt.s32.totalorder %s615_s29, %s1205_s1 }
  0x30   :  { %p617_p1 = scmp.ne.s32.totalorder %s615_s29, %s616_s30  ;;  %p620_p3 = scmp.lt.s32.totalorder %s1045_s6, %s616_s30 }
  0x32   :  { %p621_p4 = por %p620_p3, %p619_p2 }
  0x34   :  { %p622_p5 = pnand %p621_p4, %p617_p1 }
  0x36   :  { %625 = shalt.err (!%p622_p5)  }
  0x37   :  { %85 = dma.hbm_to_vmem [thread:$0]  %s81_s23, 16, %s83_s21, [#allocation2 + $0x3] }
  0x38   :  { %s991_s5 = smov [#allocation5 + $0x4]   ;;  %s484_s7 = sld [smem:[#allocation4 + $0x5]] }
  0x39   :  { %s100_s20 = sshll.u32 %s991_s5, 4  ;;  %s992_s8 = smov [#allocation5 + $0x5]   ;;  %s101_s20 = int_to_ptr.vmem [resolvable:$true] %s100_s20 }
  0x3a   :  { %s1077_s9 = sshll.u32 %s992_s8, 4  ;;  %s485_s10 = sld [smem:[#allocation4 + $0x6]]  ;;  %s119_s9 = int_to_ptr.vmem [resolvable:$true] %s1077_s9 }
  0x3b   :  { %s88_s13 = scalar_lea.hbm %s1205_s1, %s483_s28  ;;  %s993_s16 = smov [#allocation5 + $0x6]  }
  0x3c   :  { %s98_s14 = sshll.u32 %s88_s13, 4  ;;  %s1083_s17 = sshll.u32 %s993_s16, 4  ;;  %s99_s14 = int_to_ptr.hbm [resolvable:$true] %s98_s14  ;;  %s137_s17 = int_to_ptr.vmem [resolvable:$true] %s1083_s17 }
  0x3d   :  { %s638_s0 = sshra.s32 %s99_s14, 4  ;;  %s639_s0 = int_to_ptr.hbm [resolvable:$true] %s638_s0 }
  0x3e   :  { %s640_s19 = scalar_lea.hbm %s639_s0, 1  ;;  %p643_p7 = scmp.lt.s32.totalorder %s639_s0, %s1205_s1 }
  0x3f   :  { %p641_p6 = scmp.ne.s32.totalorder %s639_s0, %s640_s19  ;;  %p644_p8 = scmp.lt.s32.totalorder %s1045_s6, %s640_s19 }
  0x41   :  { %p645_p9 = por %p644_p8, %p643_p7 }
  0x43   :  { %p646_p10 = pnand %p645_p9, %p641_p6 }
  0x45   :  { %649 = shalt.err (!%p646_p10)  }
  0x46   :  { %103 = dma.hbm_to_vmem [thread:$0]  %s99_s14, 16, %s101_s20, [#allocation2 + $0x4] }
  0x47   :  { %s106_s26 = scalar_lea.hbm %s1205_s1, %s484_s7  ;;  %s124_s28 = scalar_lea.hbm %s1205_s1, %s485_s10 }
  0x48   :  { %s116_s27 = sshll.u32 %s106_s26, 4  ;;  %s134_s29 = sshll.u32 %s124_s28, 4  ;;  %s117_s27 = int_to_ptr.hbm [resolvable:$true] %s116_s27  ;;  %s135_s29 = int_to_ptr.hbm [resolvable:$true] %s134_s29 }
  0x49   :  { %s662_s30 = sshra.s32 %s117_s27, 4  ;;  %s663_s30 = int_to_ptr.hbm [resolvable:$true] %s662_s30 }
  0x4a   :  { %s664_s3 = scalar_lea.hbm %s663_s30, 1  ;;  %p667_p12 = scmp.lt.s32.totalorder %s663_s30, %s1205_s1 }
  0x4b   :  { %p665_p11 = scmp.ne.s32.totalorder %s663_s30, %s664_s3  ;;  %p668_p13 = scmp.lt.s32.totalorder %s1045_s6, %s664_s3 }
  0x4d   :  { %p669_p0 = por %p668_p13, %p667_p12 }
  0x4f   :  { %p670_p1 = pnand %p669_p0, %p665_p11 }
  0x51   :  { %673 = shalt.err (!%p670_p1)  }
  0x52   :  { %121 = dma.hbm_to_vmem [thread:$0]  %s117_s27, 16, %s119_s9, [#allocation2 + $0x5] }
  0x53   :  { %s486_s20 = sld [smem:[#allocation4 + $0x7]]  ;;  %s686_s7 = sshra.s32 %s135_s29, 4  ;;  %s687_s7 = int_to_ptr.hbm [resolvable:$true] %s686_s7 }
  0x54   :  { %s688_s8 = scalar_lea.hbm %s687_s7, 1  ;;  %p691_p3 = scmp.lt.s32.totalorder %s687_s7, %s1205_s1 }
  0x55   :  { %p689_p2 = scmp.ne.s32.totalorder %s687_s7, %s688_s8  ;;  %p692_p4 = scmp.lt.s32.totalorder %s1045_s6, %s688_s8 }
  0x57   :  { %p693_p5 = por %p692_p4, %p691_p3 }
  0x59   :  { %p694_p6 = pnand %p693_p5, %p689_p2 }
  0x5b   :  { %697 = shalt.err (!%p694_p6)  }
  0x5c   :  { %139 = dma.hbm_to_vmem [thread:$0]  %s135_s29, 16, %s137_s17, [#allocation2 + $0x6] }
  0x5d   :  { %s487_s12 = sld [smem:[#allocation4 + $0x8]]  ;;  %s994_s13 = smov [#allocation5 + $0x7]  }
  0x5e   :  { %s154_s14 = sshll.u32 %s994_s13, 4  ;;  %s995_s9 = smov [#allocation5 + $0x8]   ;;  %s155_s14 = int_to_ptr.vmem [resolvable:$true] %s154_s14 }
  0x5f   :  { %s1106_s16 = sshll.u32 %s995_s9, 4  ;;  %s1109_s0 = sld [smem:[#allocation4 + $0x9]]  ;;  %s173_s16 = int_to_ptr.vmem [resolvable:$true] %s1106_s16 }
  0x60   :  { %s142_s23 = scalar_lea.hbm %s1205_s1, %s486_s20  ;;  %s996_s25 = smov [#allocation5 + $0x9]  }
  0x61   :  { %s152_s24 = sshll.u32 %s142_s23, 4  ;;  %s1114_s26 = sshll.u32 %s996_s25, 4  ;;  %s153_s24 = int_to_ptr.hbm [resolvable:$true] %s152_s24  ;;  %s191_s26 = int_to_ptr.vmem [resolvable:$true] %s1114_s26 }
  0x62   :  { %s710_s21 = sshra.s32 %s153_s24, 4  ;;  %s711_s21 = int_to_ptr.hbm [resolvable:$true] %s710_s21 }
  0x63   :  { %s160_s18 = scalar_lea.hbm %s1205_s1, %s487_s12  ;;  %s712_s28 = scalar_lea.hbm %s711_s21, 1 }
  0x64   :  { %p713_p7 = scmp.ne.s32.totalorder %s711_s21, %s712_s28  ;;  %p715_p8 = scmp.lt.s32.totalorder %s711_s21, %s1205_s1 }
  0x65   :  { %p716_p9 = scmp.lt.s32.totalorder %s1045_s6, %s712_s28 }
  0x67   :  { %p717_p10 = por %p716_p9, %p715_p8 }
  0x69   :  { %p718_p11 = pnand %p717_p10, %p713_p7 }
  0x6b   :  { %721 = shalt.err (!%p718_p11)  }
  0x6c   :  { %157 = dma.hbm_to_vmem [thread:$0]  %s153_s24, 16, %s155_s14, [#allocation2 + $0x7] }
  0x6d   :  { %s170_s3 = sshll.u32 %s160_s18, 4  ;;  %s178_s20 = scalar_lea.hbm %s1205_s1, %s1109_s0  ;;  %s171_s3 = int_to_ptr.hbm [resolvable:$true] %s170_s3 }
  0x6e   :  { %s734_s7 = sshra.s32 %s171_s3, 4  ;;  %s735_s7 = int_to_ptr.hbm [resolvable:$true] %s734_s7 }
  0x6f   :  { %s736_s8 = scalar_lea.hbm %s735_s7, 1  ;;  %p739_p13 = scmp.lt.s32.totalorder %s735_s7, %s1205_s1 }
  0x70   :  { %p737_p12 = scmp.ne.s32.totalorder %s735_s7, %s736_s8  ;;  %p740_p0 = scmp.lt.s32.totalorder %s1045_s6, %s736_s8 }
  0x72   :  { %p741_p1 = por %p740_p0, %p739_p13 }
  0x74   :  { %p742_p2 = pnand %p741_p1, %p737_p12 }
  0x76   :  { %745 = shalt.err (!%p742_p2)  }
  0x77   :  { %175 = dma.hbm_to_vmem [thread:$0]  %s171_s3, 16, %s173_s16, [#allocation2 + $0x8] }
  0x78   :  { %s188_s12 = sshll.u32 %s178_s20, 4  ;;  %s489_s13 = sld [smem:[#allocation4 + $0xa]]  ;;  %s189_s12 = int_to_ptr.hbm [resolvable:$true] %s188_s12 }
  0x79   :  { %s758_s14 = sshra.s32 %s189_s12, 4  ;;  %s759_s14 = int_to_ptr.hbm [resolvable:$true] %s758_s14 }
  0x7a   :  { %s760_s9 = scalar_lea.hbm %s759_s14, 1  ;;  %p763_p4 = scmp.lt.s32.totalorder %s759_s14, %s1205_s1 }
  0x7b   :  { %p761_p3 = scmp.ne.s32.totalorder %s759_s14, %s760_s9  ;;  %p764_p5 = scmp.lt.s32.totalorder %s1045_s6, %s760_s9 }
  0x7d   :  { %p765_p6 = por %p764_p5, %p763_p4 }
  0x7f   :  { %p766_p7 = pnand %p765_p6, %p761_p3 }
  0x81   :  { %769 = shalt.err (!%p766_p7)  }
  0x82   :  { %193 = dma.hbm_to_vmem [thread:$0]  %s189_s12, 16, %s191_s26, [#allocation2 + $0x9] }
  0x83   :  { %s997_s22 = smov [#allocation5 + $0xa]   ;;  %s490_s24 = sld [smem:[#allocation4 + $0xb]] }
  0x84   :  { %s208_s23 = sshll.u32 %s997_s22, 4  ;;  %s998_s16 = smov [#allocation5 + $0xb]   ;;  %s209_s23 = int_to_ptr.vmem [resolvable:$true] %s208_s23 }
  0x85   :  { %s1138_s25 = sshll.u32 %s998_s16, 4  ;;  %s491_s17 = sld [smem:[#allocation4 + $0xc]]  ;;  %s227_s25 = int_to_ptr.vmem [resolvable:$true] %s1138_s25 }
  0x86   :  { %s196_s21 = scalar_lea.hbm %s1205_s1, %s489_s13  ;;  %s999_s29 = smov [#allocation5 + $0xc]  }
  0x87   :  { %s206_s28 = sshll.u32 %s196_s21, 4  ;;  %s1144_s30 = sshll.u32 %s999_s29, 4  ;;  %s207_s28 = int_to_ptr.hbm [resolvable:$true] %s206_s28  ;;  %s245_s30 = int_to_ptr.vmem [resolvable:$true] %s1144_s30 }
  0x88   :  { %s782_s26 = sshra.s32 %s207_s28, 4  ;;  %s783_s26 = int_to_ptr.hbm [resolvable:$true] %s782_s26 }
  0x89   :  { %s784_s3 = scalar_lea.hbm %s783_s26, 1  ;;  %p787_p9 = scmp.lt.s32.totalorder %s783_s26, %s1205_s1 }
  0x8a   :  { %p785_p8 = scmp.ne.s32.totalorder %s783_s26, %s784_s3  ;;  %p788_p10 = scmp.lt.s32.totalorder %s1045_s6, %s784_s3 }
  0x8c   :  { %p789_p11 = por %p788_p10, %p787_p9 }
  0x8e   :  { %p790_p12 = pnand %p789_p11, %p785_p8 }
  0x90   :  { %793 = shalt.err (!%p790_p12)  }
  0x91   :  { %211 = dma.hbm_to_vmem [thread:$0]  %s207_s28, 16, %s209_s23, [#allocation2 + $0xa] }
  0x92   :  { %s214_s8 = scalar_lea.hbm %s1205_s1, %s490_s24  ;;  %s232_s13 = scalar_lea.hbm %s1205_s1, %s491_s17 }
  0x93   :  { %s224_s10 = sshll.u32 %s214_s8, 4  ;;  %s242_s14 = sshll.u32 %s232_s13, 4  ;;  %s225_s10 = int_to_ptr.hbm [resolvable:$true] %s224_s10  ;;  %s243_s14 = int_to_ptr.hbm [resolvable:$true] %s242_s14 }
  0x94   :  { %s806_s9 = sshra.s32 %s225_s10, 4  ;;  %s807_s9 = int_to_ptr.hbm [resolvable:$true] %s806_s9 }
  0x95   :  { %s808_s0 = scalar_lea.hbm %s807_s9, 1  ;;  %p811_p0 = scmp.lt.s32.totalorder %s807_s9, %s1205_s1 }
  0x96   :  { %p809_p13 = scmp.ne.s32.totalorder %s807_s9, %s808_s0  ;;  %p812_p1 = scmp.lt.s32.totalorder %s1045_s6, %s808_s0 }
  0x98   :  { %p813_p2 = por %p812_p1, %p811_p0 }
  0x9a   :  { %p814_p3 = pnand %p813_p2, %p809_p13 }
  0x9c   :  { %817 = shalt.err (!%p814_p3)  }
  0x9d   :  { %229 = dma.hbm_to_vmem [thread:$0]  %s225_s10, 16, %s227_s25, [#allocation2 + $0xb] }
  0x9e   :  { %s492_s23 = sld [smem:[#allocation4 + $0xd]]  ;;  %s830_s24 = sshra.s32 %s243_s14, 4  ;;  %s831_s24 = int_to_ptr.hbm [resolvable:$true] %s830_s24 }
  0x9f   :  { %s832_s16 = scalar_lea.hbm %s831_s24, 1  ;;  %p835_p5 = scmp.lt.s32.totalorder %s831_s24, %s1205_s1 }
  0xa0   :  { %p833_p4 = scmp.ne.s32.totalorder %s831_s24, %s832_s16  ;;  %p836_p6 = scmp.lt.s32.totalorder %s1045_s6, %s832_s16 }
  0xa2   :  { %p837_p7 = por %p836_p6, %p835_p5 }
  0xa4   :  { %p838_p8 = pnand %p837_p7, %p833_p4 }
  0xa6   :  { %841 = shalt.err (!%p838_p8)  }
  0xa7   :  { %247 = dma.hbm_to_vmem [thread:$0]  %s243_s14, 16, %s245_s30, [#allocation2 + $0xc] }
  0xa8   :  { %s493_s18 = sld [smem:[#allocation4 + $0xe]]  ;;  %s1000_s21 = smov [#allocation5 + $0xd]  }
  0xa9   :  { %s262_s28 = sshll.u32 %s1000_s21, 4  ;;  %s1001_s25 = smov [#allocation5 + $0xe]   ;;  %s263_s28 = int_to_ptr.vmem [resolvable:$true] %s262_s28 }
  0xaa   :  { %s1167_s29 = sshll.u32 %s1001_s25, 4  ;;  %s1170_s26 = sld [smem:[#allocation4 + $0xf]]  ;;  %s281_s29 = int_to_ptr.vmem [resolvable:$true] %s1167_s29 }
  0xab   :  { %s250_s5 = scalar_lea.hbm %s1205_s1, %s492_s23  ;;  %s1002_s7 = smov [#allocation5 + $0xf]  }
  0xac   :  { %s260_s20 = sshll.u32 %s250_s5, 4  ;;  %s1175_s8 = sshll.u32 %s1002_s7, 4  ;;  %s261_s20 = int_to_ptr.hbm [resolvable:$true] %s260_s20  ;;  %s299_s8 = int_to_ptr.vmem [resolvable:$true] %s1175_s8 }
  0xad   :  { %s854_s12 = sshra.s32 %s261_s20, 4  ;;  %s855_s12 = int_to_ptr.hbm [resolvable:$true] %s854_s12 }
  0xae   :  { %s268_s11 = scalar_lea.hbm %s1205_s1, %s493_s18  ;;  %s856_s13 = scalar_lea.hbm %s855_s12, 1 }
  0xaf   :  { %p857_p9 = scmp.ne.s32.totalorder %s855_s12, %s856_s13  ;;  %p859_p10 = scmp.lt.s32.totalorder %s855_s12, %s1205_s1 }
  0xb0   :  { %p860_p11 = scmp.lt.s32.totalorder %s1045_s6, %s856_s13 }
  0xb2   :  { %p861_p12 = por %p860_p11, %p859_p10 }
  0xb4   :  { %p862_p13 = pnand %p861_p12, %p857_p9 }
  0xb6   :  { %865 = shalt.err (!%p862_p13)  }
  0xb7   :  { %265 = dma.hbm_to_vmem [thread:$0]  %s261_s20, 16, %s263_s28, [#allocation2 + $0xd] }
  0xb8   :  { %s278_s0 = sshll.u32 %s268_s11, 4  ;;  %s286_s23 = scalar_lea.hbm %s1205_s1, %s1170_s26  ;;  %s279_s0 = int_to_ptr.hbm [resolvable:$true] %s278_s0 }
  0xb9   :  { %s878_s24 = sshra.s32 %s279_s0, 4  ;;  %s879_s24 = int_to_ptr.hbm [resolvable:$true] %s878_s24 }
  0xba   :  { %s880_s16 = scalar_lea.hbm %s879_s24, 1  ;;  %p883_p1 = scmp.lt.s32.totalorder %s879_s24, %s1205_s1 }
  0xbb   :  { %p881_p0 = scmp.ne.s32.totalorder %s879_s24, %s880_s16  ;;  %p884_p2 = scmp.lt.s32.totalorder %s1045_s6, %s880_s16 }
  0xbd   :  { %p885_p3 = por %p884_p2, %p883_p1 }
  0xbf   :  { %p886_p4 = pnand %p885_p3, %p881_p0 }
  0xc1   :  { %889 = shalt.err (!%p886_p4)  }
  0xc2   :  { %283 = dma.hbm_to_vmem [thread:$0]  %s279_s0, 16, %s281_s29, [#allocation2 + $0xe] }
  0xc3   :  { %s296_s18 = sshll.u32 %s286_s23, 4  ;;  %s297_s18 = int_to_ptr.hbm [resolvable:$true] %s296_s18 }
  0xc4   :  { %s902_s21 = sshra.s32 %s297_s18, 4  ;;  %s903_s21 = int_to_ptr.hbm [resolvable:$true] %s902_s21 }
  0xc5   :  { %s904_s28 = scalar_lea.hbm %s903_s21, 1  ;;  %p907_p6 = scmp.lt.s32.totalorder %s903_s21, %s1205_s1 }
  0xc6   :  { %p905_p5 = scmp.ne.s32.totalorder %s903_s21, %s904_s28  ;;  %p908_p7 = scmp.lt.s32.totalorder %s1045_s6, %s904_s28 }
  0xc8   :  { %p909_p8 = por %p908_p7, %p907_p6 }
  0xca   :  { %p910_p9 = pnand %p909_p8, %p905_p5 }
  0xcc   :  { %913 = shalt.err (!%p910_p9)  }
  0xcd   :  { %301 = dma.hbm_to_vmem [thread:$0]  %s297_s18, 16, %s299_s8, [#allocation2 + $0xf] }
  0xce   :  { %952 = dma.done.wait [#allocation2], 16 }
  0xcf   :  { %953 = vsyncadd [#allocation2], 4294967280 }
  0xd0   :  { %954 = dma.done.wait [#allocation2 + $0x1], 16 }
  0xd1   :  { %955 = vsyncadd [#allocation2 + $0x1], 4294967280 }
  0xd2   :  { %956 = dma.done.wait [#allocation2 + $0x2], 16 }
  0xd3   :  { %957 = vsyncadd [#allocation2 + $0x2], 4294967280 }
  0xd4   :  { %958 = dma.done.wait [#allocation2 + $0x3], 16 }
  0xd5   :  { %959 = vsyncadd [#allocation2 + $0x3], 4294967280 }
  0xd6   :  { %960 = dma.done.wait [#allocation2 + $0x4], 16 }
  0xd7   :  { %961 = vsyncadd [#allocation2 + $0x4], 4294967280 }
  0xd8   :  { %962 = dma.done.wait [#allocation2 + $0x5], 16 }
  0xd9   :  { %963 = vsyncadd [#allocation2 + $0x5], 4294967280 }
  0xda   :  { %964 = dma.done.wait [#allocation2 + $0x6], 16 }
  0xdb   :  { %965 = vsyncadd [#allocation2 + $0x6], 4294967280 }
  0xdc   :  { %966 = dma.done.wait [#allocation2 + $0x7], 16 }
  0xdd   :  { %967 = vsyncadd [#allocation2 + $0x7], 4294967280 }
  0xde   :  { %968 = dma.done.wait [#allocation2 + $0x8], 16 }
  0xdf   :  { %969 = vsyncadd [#allocation2 + $0x8], 4294967280 }
  0xe0   :  { %970 = dma.done.wait [#allocation2 + $0x9], 16 }
  0xe1   :  { %971 = vsyncadd [#allocation2 + $0x9], 4294967280 }
  0xe2   :  { %972 = dma.done.wait [#allocation2 + $0xa], 16 }
  0xe3   :  { %973 = vsyncadd [#allocation2 + $0xa], 4294967280 }
  0xe4   :  { %974 = dma.done.wait [#allocation2 + $0xb], 16 }
  0xe5   :  { %975 = vsyncadd [#allocation2 + $0xb], 4294967280 }
  0xe6   :  { %976 = dma.done.wait [#allocation2 + $0xc], 16 }
  0xe7   :  { %977 = vsyncadd [#allocation2 + $0xc], 4294967280 }
  0xe8   :  { %978 = dma.done.wait [#allocation2 + $0xd], 16 }
  0xe9   :  { %979 = vsyncadd [#allocation2 + $0xd], 4294967280 }
  0xea   :  { %980 = dma.done.wait [#allocation2 + $0xe], 16 }
  0xeb   :  { %981 = vsyncadd [#allocation2 + $0xe], 4294967280 }
  0xec   :  { %982 = dma.done.wait [#allocation2 + $0xf], 16 }
  0xed   :  { %983 = vsyncadd [#allocation2 + $0xf], 4294967280  ;;  %s341_s29 = sshll.u32 %s1206_s2, 4  ;;  %s1003_s3 = smov 128   ;;  %s342_s29 = int_to_ptr.hbm [resolvable:$true] %s341_s29 }
  0xee   :  { %s1004_s4 = smov 8  }
  0xef   :  { %347 = dma.vmem_to_hbm [thread:$0]  %s29_s15, 256, %s342_s29, [#allocation6], %s1003_s3, %s1003_s3, %s1004_s4  }
  0xf0   :  { %984 = dma.done.wait [#allocation6], 256  }
  0xf1   :  { %985 = vsyncadd [#allocation6], 4294967040 }
  0xf2   :  { %352 = vsyncpa [#allocation6], 1 }
  0xf3   :  { %353 = vsyncmov [#allocation2] }
  0xf6   :  { %s354_s5 = vpop.sfrf %353 }
  0xf7   :  { %p495_p10 = scmp.ne.s32.totalorder %s354_s5, 0 }
  0xf9   :  { %358 = shalt.err (%p495_p10)  }
  0xfa   :  { %360 = vsyncmov [#allocation2 + $0x1] }
  0xfd   :  { %s361_s20 = vpop.sfrf %360 }
  0xfe   :  { %p496_p11 = scmp.ne.s32.totalorder %s361_s20, 0 }
 0x100   :  { %365 = shalt.err (%p496_p11)  }
 0x101   :  { %367 = vsyncmov [#allocation2 + $0x2] }
 0x104   :  { %s368_s7 = vpop.sfrf %367 }
 0x105   :  { %p497_p12 = scmp.ne.s32.totalorder %s368_s7, 0 }
 0x107   :  { %372 = shalt.err (%p497_p12)  }
 0x108   :  { %374 = vsyncmov [#allocation2 + $0x3] }
 0x10b   :  { %s375_s2 = vpop.sfrf %374 }
 0x10c   :  { %p498_p13 = scmp.ne.s32.totalorder %s375_s2, 0 }
 0x10e   :  { %379 = shalt.err (%p498_p13)  }
 0x10f   :  { %381 = vsyncmov [#allocation2 + $0x4] }
 0x112   :  { %s382_s15 = vpop.sfrf %381 }
 0x113   :  { %p499_p0 = scmp.ne.s32.totalorder %s382_s15, 0 }
 0x115   :  { %386 = shalt.err (%p499_p0)  }
 0x116   :  { %388 = vsyncmov [#allocation2 + $0x5] }
 0x119   :  { %s389_s8 = vpop.sfrf %388 }
 0x11a   :  { %p500_p1 = scmp.ne.s32.totalorder %s389_s8, 0 }
 0x11c   :  { %393 = shalt.err (%p500_p1)  }
 0x11d   :  { %395 = vsyncmov [#allocation2 + $0x6] }
 0x120   :  { %s396_s30 = vpop.sfrf %395 }
 0x121   :  { %p501_p2 = scmp.ne.s32.totalorder %s396_s30, 0 }
 0x123   :  { %400 = shalt.err (%p501_p2)  }
 0x124   :  { %402 = vsyncmov [#allocation2 + $0x7] }
 0x127   :  { %s403_s10 = vpop.sfrf %402 }
 0x128   :  { %p502_p3 = scmp.ne.s32.totalorder %s403_s10, 0 }
 0x12a   :  { %407 = shalt.err (%p502_p3)  }
 0x12b   :  { %409 = vsyncmov [#allocation2 + $0x8] }
 0x12e   :  { %s410_s11 = vpop.sfrf %409 }
 0x12f   :  { %p503_p4 = scmp.ne.s32.totalorder %s410_s11, 0 }
 0x131   :  { %414 = shalt.err (%p503_p4)  }
 0x132   :  { %416 = vsyncmov [#allocation2 + $0x9] }
 0x135   :  { %s417_s12 = vpop.sfrf %416 }
 0x136   :  { %p504_p5 = scmp.ne.s32.totalorder %s417_s12, 0 }
 0x138   :  { %421 = shalt.err (%p504_p5)  }
 0x139   :  { %423 = vsyncmov [#allocation2 + $0xa] }
 0x13c   :  { %s424_s13 = vpop.sfrf %423 }
 0x13d   :  { %p505_p6 = scmp.ne.s32.totalorder %s424_s13, 0 }
 0x13f   :  { %428 = shalt.err (%p505_p6)  }
 0x140   :  { %430 = vsyncmov [#allocation2 + $0xb] }
 0x143   :  { %s431_s14 = vpop.sfrf %430 }
 0x144   :  { %p506_p7 = scmp.ne.s32.totalorder %s431_s14, 0 }
 0x146   :  { %435 = shalt.err (%p506_p7)  }
 0x147   :  { %437 = vsyncmov [#allocation2 + $0xc] }
 0x14a   :  { %s438_s9 = vpop.sfrf %437 }
 0x14b   :  { %p507_p8 = scmp.ne.s32.totalorder %s438_s9, 0 }
 0x14d   :  { %442 = shalt.err (%p507_p8)  }
 0x14e   :  { %444 = vsyncmov [#allocation2 + $0xd] }
 0x151   :  { %s445_s0 = vpop.sfrf %444 }
 0x152   :  { %p508_p9 = scmp.ne.s32.totalorder %s445_s0, 0 }
 0x154   :  { %449 = shalt.err (%p508_p9)  }
 0x155   :  { %451 = vsyncmov [#allocation2 + $0xe] }
 0x158   :  { %s452_s19 = vpop.sfrf %451 }
 0x159   :  { %p509_p10 = scmp.ne.s32.totalorder %s452_s19, 0 }
 0x15b   :  { %456 = shalt.err (%p509_p10)  }
 0x15c   :  { %458 = vsyncmov [#allocation2 + $0xf] }
 0x15f   :  { %s459_s22 = vpop.sfrf %458 }
 0x160   :  { %p510_p11 = scmp.ne.s32.totalorder %s459_s22, 0 }
 0x162   :  { %463 = shalt.err (%p510_p11)  }

</bundles_post_ra>
